<compile_context>
chip_gen: v6e
topology: v6e:2x2x1
jax: 0.10.0
libtpu: 0.0.40
codegen_flags: <defaults>
</compile_context>

<pallas_src>
import functools
import math

import jax
import jax.numpy as jnp
from jax import lax
from jax.experimental import pallas as pl
from jax.experimental.pallas import tpu as pltpu

LANES = 128
_ACC_ROWS = 8  # f32 sublane count; one partial-sum slab is (8, 128) = 1 vreg


def _fast_recip(x):
    """1/x via the EUP approximate reciprocal + 2 Newton steps (f32-accurate)."""
    r = pl.reciprocal(x, approx=True)
    r = r * (2.0 - x * r)
    r = r * (2.0 - x * r)
    return r


@functools.lru_cache(maxsize=1)
def _num_tensorcores():
    """Best-effort TensorCores-per-chip count (v7x: 2, v5e/v6e: 1)."""
    try:
        info = pltpu.get_tpu_info()
        for name in ("num_cores", "core_count", "num_tensorcores",
                     "tensorcore_count", "num_tensor_cores"):
            v = getattr(info, name, None)
            if isinstance(v, int) and v >= 1:
                return v
    except Exception:
        pass
    return 1


def _mixed_loss_partial_sums_kernel(x_ref, t_ref, out_ref, *, gamma, gamma_int,
                                    n_full_rows, n_rem, n_inner, tr,
                                    chunk_rows, n_sub, n_full_chunks, exact):
    """Per-(outer grid block) partial sums for MixedLoss.

    out_ref: f32[1, 4, 8, 128], resident across the inner (reduction) axis:
      [0] focal-loss elementwise term   [1] sigmoid(x) * t
      [2] sigmoid(x)                    [3] t
    Final cross-lane reduction happens in JAX (tiny).
    """
    j = pl.program_id(1)

    @pl.when(j == 0)
    def _():
        out_ref[...] = jnp.zeros_like(out_ref)

    def accumulate(masked, chunk=None):
        def slice_sums(k, carry):
            f_acc, st_acc, s_acc, t_acc = carry
            if isinstance(k, int):
                off = k * chunk_rows
            else:
                off = pl.multiple_of(k * chunk_rows, chunk_rows)
            x = x_ref[pl.ds(off, chunk_rows), :].astype(jnp.float32)
            t = t_ref[pl.ds(off, chunk_rows), :].astype(jnp.float32)

            if masked:
                # Row-granular validity (no int32 element-index overflow):
                # global row = chunk*tr + off + row; rows < n//128 are valid,
                # plus a lane mask on the single partial row (n % 128 lanes).
                row = lax.broadcasted_iota(jnp.int32, (chunk_rows, LANES), 0)
                grow = chunk * tr + off + row
                valid = grow < n_full_rows
                if n_rem:
                    col = lax.broadcasted_iota(jnp.int32, (chunk_rows, LANES), 1)
                    valid = valid | ((grow == n_full_rows) & (col < n_rem))
                # Mask BEFORE the transcendentals: the over-read region of a
                # partial/clamped block may hold garbage (possibly NaN/Inf).
                x = jnp.where(valid, x, 0.0)
                t = jnp.where(valid, t, 0.0)
                vf = valid.astype(jnp.float32)

            # ---- focal term: one exp + one log (+ cheap reciprocal) ----
            yx = (t * 2.0 - 1.0) * x
            e = jnp.exp(-jnp.abs(yx))                        # EUP exp
            loss = jnp.log(1.0 + e) - jnp.minimum(yx, 0.0)   # -logsigmoid(yx); EUP log
            r = _fast_recip(1.0 + e)                         # EUP approx rcp + VPU NR
            w = jnp.where(yx >= 0.0, e * r, r)               # sigmoid(-yx)
            if gamma_int is not None:
                # static integer gamma (default 2): pure VPU multiplies
                weight = jnp.ones_like(w) if gamma_int == 0 else w
                for _ in range(max(gamma_int - 1, 0)):
                    weight = weight * w
            else:
                # general gamma: logsigmoid(-yx) = -loss - yx (exact identity)
                weight = jnp.exp(gamma * (-loss - yx))       # extra EUP exp
            focal = weight * loss

            # ---- dice terms: sigmoid(x) of the raw logits ----
            ex = jnp.exp(-jnp.abs(x))                        # EUP exp
            rx = _fast_recip(1.0 + ex)
            sig = jnp.where(x >= 0.0, rx, ex * rx)

            st = sig * t                                     # t already 0 when masked
            if masked:
                focal = focal * vf
                sig = sig * vf

            def red(v):  # (chunk_rows,128) -> (8,128): pure VPU adds
                return v.reshape(chunk_rows // _ACC_ROWS, _ACC_ROWS, LANES).sum(axis=0)

            return (f_acc + red(focal), st_acc + red(st),
                    s_acc + red(sig), t_acc + red(t))

        zeros = jnp.zeros((_ACC_ROWS, LANES), jnp.float32)
        carry = (zeros, zeros, zeros, zeros)
        if n_sub <= 16:
            for k in range(n_sub):        # short static trip count: full unroll
                carry = slice_sums(k, carry)
        else:
            carry = lax.fori_loop(0, n_sub, slice_sums, carry, unroll=4)

        out_ref[0, 0] += carry[0]
        out_ref[0, 1] += carry[1]
        out_ref[0, 2] += carry[2]
        out_ref[0, 3] += carry[3]

    if exact:
        accumulate(False)
    else:
        chunk = pl.program_id(0) * n_inner + j   # logical (unclamped) chunk id
        needs_mask = chunk >= n_full_chunks

        @pl.when(jnp.logical_not(needs_mask))
        def _():
            accumulate(False)

        @pl.when(needs_mask)
        def _():
            accumulate(True, chunk=chunk)


def mixed_loss(input_, target, *, alpha, gamma, tile_rows=4096):
    """MixedLoss forward: alpha * focal.mean() - dice_loss(input, target)."""
    if input_.shape != target.shape:
        raise ValueError("Target size ({}) and input size ({}) must be the same"
                         .format(target.shape, input_.shape))
    n = input_.size                       # static Python int (valid elements)

    x = input_.reshape(-1)                # stream in original dtype; cast in vregs
    t = target.reshape(-1)

    # Sublane granule of the narrower dtype (f32:8, bf16/f16:16, int8/fp8:32).
    itemsize = min(x.dtype.itemsize, t.dtype.itemsize)
    g = {4: 8, 2: 16, 1: 32}.get(itemsize, 8)
    align = g * LANES

    # Host pad (extra HBM copy) ONLY when the flat size cannot be viewed as
    # (rows, 128) with at least one full granule of rows; ragged row counts are
    # handled in-kernel by the masked last chunk instead.
    if (n % LANES != 0) or (n // LANES < g):
        total = pl.cdiv(n, align) * align
        x = jnp.pad(x, (0, total - n))
        t = jnp.pad(t, (0, total - n))
    else:
        total = n
    rows = total // LANES
    x2 = x.reshape(rows, LANES)           # contiguous reshape: no copy
    t2 = t.reshape(rows, LANES)

    tr = max(g, (min(tile_rows, rows) // g) * g)   # DMA tile rows (multiple of g)
    n_chunks = pl.cdiv(rows, tr)

    # Split across TensorCores only when the chip actually has >1 (v7x).
    n_outer = 2 if (_num_tensorcores() >= 2 and n_chunks >= 2) else 1
    n_inner = pl.cdiv(n_chunks, n_outer)

    # Chunks entirely inside the first n valid elements never need the mask.
    n_full_chunks = n // (tr * LANES)
    exact = (n_full_chunks == n_outer * n_inner)

    # Inner row-chunk size: keeps per-slice intermediates register-friendly.
    chunk_rows = math.gcd(tr, 256)
    n_sub = tr // chunk_rows

    def in_map(i, j):
        # Clamp duplicated trailing steps onto the last real block (their
        # contribution is masked to zero inside the kernel).
        return (jnp.minimum(i * n_inner + j, n_chunks - 1), 0)

    in_spec = pl.BlockSpec((tr, LANES), in_map)
    out_spec = pl.BlockSpec((1, 4, _ACC_ROWS, LANES), lambda i, j: (i, 0, 0, 0))

    g_f = float(gamma)
    gamma_int = int(g_f) if (g_f.is_integer() and 0.0 <= g_f <= 8.0) else None

    kernel = functools.partial(
        _mixed_loss_partial_sums_kernel,
        gamma=g_f, gamma_int=gamma_int,
        n_full_rows=n // LANES, n_rem=n % LANES,
        n_inner=n_inner, tr=tr, chunk_rows=chunk_rows, n_sub=n_sub,
        n_full_chunks=n_full_chunks, exact=exact)

    partials = pl.pallas_call(
        kernel,
        out_shape=jax.ShapeDtypeStruct((n_outer, 4, _ACC_ROWS, LANES),
                                       jnp.float32),
        grid_spec=pltpu.PrefetchScalarGridSpec(
            num_scalar_prefetch=0,
            grid=(n_outer, n_inner),
            in_specs=[in_spec, in_spec],
            out_specs=out_spec,
        ),
        compiler_params=pltpu.CompilerParams(
            dimension_semantics=("parallel", "arbitrary"),
            vmem_limit_bytes=32 * 1024 * 1024,
        ),
    )(x2, t2)

    sums = jnp.sum(partials, axis=(0, 2, 3))     # (4,) tiny final reduce in JAX
    sum_focal, sum_st, sum_s, sum_t = sums[0], sums[1], sums[2], sums[3]

    smooth = 1.0
    focal_mean = sum_focal / n
    dice = 1.0 - (2.0 * sum_st + smooth) / (sum_s + sum_t + smooth)
    return alpha * focal_mean - dice


def _mixed_loss_ref(input_, target, *, alpha, gamma):
    """Pure-JAX reference (mirrors the PyTorch module)."""
    x = input_.astype(jnp.float32)
    t = target.astype(jnp.float32)
    yx = (t * 2.0 - 1.0) * x
    loss = -jax.nn.log_sigmoid(yx)
    focal = jnp.exp(gamma * jax.nn.log_sigmoid(-yx)) * loss
    focal_mean = jnp.mean(focal)

    sig = jax.nn.sigmoid(x)
    num = jnp.sum(sig * t)
    den = jnp.sum(sig) + jnp.sum(t)
    dice = 1.0 - (2.0 * num + 1.0) / (den + 1.0)
    return alpha * focal_mean - dice


if __name__ == "__main__":
    ALPHA = 10.0
    GAMMA = 2.0

    key = jax.random.PRNGKey(0)
    k1, k2, k3, k4, k5, k6 = jax.random.split(key, 6)

    # 1) Small aligned f32 NCHW logits / binary targets: single chunk, exact
    #    (mask-free) path, integer-gamma VPU weight.
    x = jax.random.normal(k1, (2, 4, 16, 16), dtype=jnp.float32)
    t = jax.random.bernoulli(k2, 0.3, (2, 4, 16, 16)).astype(jnp.float32)
    out = jax.block_until_ready(mixed_loss(x, t, alpha=ALPHA, gamma=GAMMA))
    ref = _mixed_loss_ref(x, t, alpha=ALPHA, gamma=GAMMA)
    assert jnp.allclose(out, ref, rtol=2e-5, atol=2e-5), (out, ref)

    # 1b) Non-integer gamma exercises the general exp(gamma*logsigmoid(-yx)) path.
    out_g = jax.block_until_ready(mixed_loss(x, t, alpha=ALPHA, gamma=2.5))
    ref_g = _mixed_loss_ref(x, t, alpha=ALPHA, gamma=2.5)
    assert jnp.allclose(out_g, ref_g, rtol=2e-5, atol=2e-5), (out_g, ref_g)

    # 2) Aligned-but-ragged f32: multi-chunk grid, interior chunks on the
    #    unmasked fast path, one pl.when-masked trailing chunk (no host pad).
    x3 = jax.random.normal(k3, (2, 4, 32, 128), dtype=jnp.float32)
    t3 = jax.random.bernoulli(k4, 0.3, (2, 4, 32, 128)).astype(jnp.float32)
    out3 = jax.block_until_ready(
        mixed_loss(x3, t3, alpha=ALPHA, gamma=GAMMA, tile_rows=96))
    ref3 = _mixed_loss_ref(x3, t3, alpha=ALPHA, gamma=GAMMA)
    assert jnp.allclose(out3, ref3, rtol=2e-5, atol=2e-5), (out3, ref3)

    # 3) Unaligned bf16: in-register upcast, host pad to a 128-lane view,
    #    lane-masked final partial row, multi-chunk grid.
    xb = jax.random.normal(k5, (2, 3, 40, 52), dtype=jnp.bfloat16)
    tb = jax.random.bernoulli(k6, 0.3, (2, 3, 40, 52)).astype(jnp.bfloat16)
    out2 = jax.block_until_ready(
        mixed_loss(xb, tb, alpha=ALPHA, gamma=GAMMA, tile_rows=32))
    ref2 = _mixed_loss_ref(xb, tb, alpha=ALPHA, gamma=GAMMA)
    assert jnp.allclose(out2, ref2, rtol=1e-4, atol=1e-4), (out2, ref2)

    print("KERNEL_OK")
</pallas_src>

<mosaic_0001>
module attributes {stable_mosaic.version = 11 : i64} {
  func.func @_mixed_loss_partial_sums_kernel(%arg0: i32, %arg1: i32, %arg2: memref<16x128xf32, #tpu.memory_space<vmem>>, %arg3: memref<16x128xf32, #tpu.memory_space<vmem>>, %arg4: memref<1x4x8x128xf32, #tpu.memory_space<vmem>>) attributes {dimension_semantics = [#tpu.dimension_semantics<parallel>, #tpu.dimension_semantics<arbitrary>], iteration_bounds = array<i64: 1, 1>, scalar_prefetch = 0 : i64, scratch_operands = 0 : i64, tpu.core_type = #tpu.core_type<tc>, window_params = [{transform_indices = @transform_0, window_bounds = array<i64: 16, 128>}, {transform_indices = @transform_1, window_bounds = array<i64: 16, 128>}, {transform_indices = @transform_2, window_bounds = array<i64: 1, 4, 8, 128>}]} {
    %c0_i32 = arith.constant 0 : i32
    %0 = arith.cmpi eq, %arg1, %c0_i32 : i32
    %1 = arith.extui %0 : i1 to i32
    %c0_i32_0 = arith.constant 0 : i32
    %2 = arith.cmpi ne, %1, %c0_i32_0 : i32
    scf.if %2 {
      %cst_51 = arith.constant 0.000000e+00 : f32
      %94 = vector.broadcast %cst_51 : f32 to vector<1x4x8x128xf32>
      %c0_52 = arith.constant 0 : index
      %c0_53 = arith.constant 0 : index
      %c0_54 = arith.constant 0 : index
      %c0_55 = arith.constant 0 : index
      %95 = vector.load %arg4[%c0_52, %c0_53, %c0_54, %c0_55] : memref<1x4x8x128xf32, #tpu.memory_space<vmem>>, vector<1x4x8x128xf32>
      tpu.vector_store %arg4[%c0_52, %c0_53, %c0_54, %c0_55], %94 {strides = array<i32>} : memref<1x4x8x128xf32, #tpu.memory_space<vmem>>, vector<1x4x8x128xf32>,
    } else {
    }
    %cst = arith.constant 0.000000e+00 : f32
    %3 = vector.broadcast %cst : f32 to vector<8x128xf32>
    %c0 = arith.constant 0 : index
    %c0_1 = arith.constant 0 : index
    %4 = vector.load %arg2[%c0, %c0_1] : memref<16x128xf32, #tpu.memory_space<vmem>>, vector<16x128xf32>
    %c0_2 = arith.constant 0 : index
    %c0_3 = arith.constant 0 : index
    %5 = vector.load %arg3[%c0_2, %c0_3] : memref<16x128xf32, #tpu.memory_space<vmem>>, vector<16x128xf32>
    %cst_4 = arith.constant 2.000000e+00 : f32
    %6 = vector.broadcast %cst_4 : f32 to vector<16x128xf32>
    %7 = arith.mulf %5, %6 : vector<16x128xf32>
    %cst_5 = arith.constant 1.000000e+00 : f32
    %8 = vector.broadcast %cst_5 : f32 to vector<16x128xf32>
    %9 = arith.subf %7, %8 : vector<16x128xf32>
    %10 = arith.mulf %9, %4 : vector<16x128xf32>
    %11 = math.absf %10 : vector<16x128xf32>
    %cst_6 = arith.constant 0.000000e+00 : f32
    %12 = vector.broadcast %cst_6 : f32 to vector<16x128xf32>
    %13 = arith.subf %12, %11 : vector<16x128xf32>
    %14 = math.exp %13 : vector<16x128xf32>
    %cst_7 = arith.constant 1.000000e+00 : f32
    %15 = vector.broadcast %cst_7 : f32 to vector<16x128xf32>
    %16 = arith.addf %15, %14 : vector<16x128xf32>
    %17 = math.log %16 : vector<16x128xf32>
    %cst_8 = arith.constant 0.000000e+00 : f32
    %18 = vector.broadcast %cst_8 : f32 to vector<16x128xf32>
    %19 = arith.minimumf %10, %18 : vector<16x128xf32>
    %20 = arith.subf %17, %19 : vector<16x128xf32>
    %cst_9 = arith.constant 1.000000e+00 : f32
    %21 = vector.broadcast %cst_9 : f32 to vector<16x128xf32>
    %22 = arith.addf %21, %14 : vector<16x128xf32>
    %23 = tpu.reciprocal %22 {approx = true} : vector<16x128xf32> -> vector<16x128xf32>
    %24 = arith.mulf %22, %23 : vector<16x128xf32>
    %cst_10 = arith.constant 2.000000e+00 : f32
    %25 = vector.broadcast %cst_10 : f32 to vector<16x128xf32>
    %26 = arith.subf %25, %24 : vector<16x128xf32>
    %27 = arith.mulf %23, %26 : vector<16x128xf32>
    %28 = arith.mulf %22, %27 : vector<16x128xf32>
    %cst_11 = arith.constant 2.000000e+00 : f32
    %29 = vector.broadcast %cst_11 : f32 to vector<16x128xf32>
    %30 = arith.subf %29, %28 : vector<16x128xf32>
    %31 = arith.mulf %27, %30 : vector<16x128xf32>
    %cst_12 = arith.constant 0.000000e+00 : f32
    %32 = vector.broadcast %cst_12 : f32 to vector<16x128xf32>
    %33 = arith.cmpf oge, %10, %32 : vector<16x128xf32>
    %34 = arith.mulf %14, %31 : vector<16x128xf32>
    %35 = arith.select %33, %34, %31 : vector<16x128xi1>, vector<16x128xf32>
    %36 = arith.mulf %35, %35 : vector<16x128xf32>
    %37 = arith.mulf %36, %20 : vector<16x128xf32>
    %38 = math.absf %4 : vector<16x128xf32>
    %cst_13 = arith.constant 0.000000e+00 : f32
    %39 = vector.broadcast %cst_13 : f32 to vector<16x128xf32>
    %40 = arith.subf %39, %38 : vector<16x128xf32>
    %41 = math.exp %40 : vector<16x128xf32>
    %cst_14 = arith.constant 1.000000e+00 : f32
    %42 = vector.broadcast %cst_14 : f32 to vector<16x128xf32>
    %43 = arith.addf %42, %41 : vector<16x128xf32>
    %44 = tpu.reciprocal %43 {approx = true} : vector<16x128xf32> -> vector<16x128xf32>
    %45 = arith.mulf %43, %44 : vector<16x128xf32>
    %cst_15 = arith.constant 2.000000e+00 : f32
    %46 = vector.broadcast %cst_15 : f32 to vector<16x128xf32>
    %47 = arith.subf %46, %45 : vector<16x128xf32>
    %48 = arith.mulf %44, %47 : vector<16x128xf32>
    %49 = arith.mulf %43, %48 : vector<16x128xf32>
    %cst_16 = arith.constant 2.000000e+00 : f32
    %50 = vector.broadcast %cst_16 : f32 to vector<16x128xf32>
    %51 = arith.subf %50, %49 : vector<16x128xf32>
    %52 = arith.mulf %48, %51 : vector<16x128xf32>
    %cst_17 = arith.constant 0.000000e+00 : f32
    %53 = vector.broadcast %cst_17 : f32 to vector<16x128xf32>
    %54 = arith.cmpf oge, %4, %53 : vector<16x128xf32>
    %55 = arith.mulf %41, %52 : vector<16x128xf32>
    %56 = arith.select %54, %52, %55 : vector<16x128xi1>, vector<16x128xf32>
    %57 = arith.mulf %56, %5 : vector<16x128xf32>
    %58 = vector.shape_cast %37 : vector<16x128xf32> to vector<2x8x128xf32>
    %cst_18 = arith.constant dense<0.000000e+00> : vector<8x128xf32>
    %59 = vector.multi_reduction <add>, %58, %cst_18 [0] : vector<2x8x128xf32> to vector<8x128xf32>
    %60 = arith.addf %3, %59 : vector<8x128xf32>
    %61 = vector.shape_cast %57 : vector<16x128xf32> to vector<2x8x128xf32>
    %cst_19 = arith.constant dense<0.000000e+00> : vector<8x128xf32>
    %62 = vector.multi_reduction <add>, %61, %cst_19 [0] : vector<2x8x128xf32> to vector<8x128xf32>
    %63 = arith.addf %3, %62 : vector<8x128xf32>
    %64 = vector.shape_cast %56 : vector<16x128xf32> to vector<2x8x128xf32>
    %cst_20 = arith.constant dense<0.000000e+00> : vector<8x128xf32>
    %65 = vector.multi_reduction <add>, %64, %cst_20 [0] : vector<2x8x128xf32> to vector<8x128xf32>
    %66 = arith.addf %3, %65 : vector<8x128xf32>
    %67 = vector.shape_cast %5 : vector<16x128xf32> to vector<2x8x128xf32>
    %cst_21 = arith.constant dense<0.000000e+00> : vector<8x128xf32>
    %68 = vector.multi_reduction <add>, %67, %cst_21 [0] : vector<2x8x128xf32> to vector<8x128xf32>
    %69 = arith.addf %3, %68 : vector<8x128xf32>
    %c0_22 = arith.constant 0 : index
    %c0_23 = arith.constant 0 : index
    %c0_24 = arith.constant 0 : index
    %c0_25 = arith.constant 0 : index
    %70 = vector.load %arg4[%c0_22, %c0_23, %c0_24, %c0_25] : memref<1x4x8x128xf32, #tpu.memory_space<vmem>>, vector<1x1x8x128xf32>
    %71 = vector.shape_cast %70 : vector<1x1x8x128xf32> to vector<8x128xf32>
    %72 = arith.addf %71, %60 : vector<8x128xf32>
    %c0_26 = arith.constant 0 : index
    %c0_27 = arith.constant 0 : index
    %c0_28 = arith.constant 0 : index
    %c0_29 = arith.constant 0 : index
    %73 = vector.load %arg4[%c0_26, %c0_27, %c0_28, %c0_29] : memref<1x4x8x128xf32, #tpu.memory_space<vmem>>, vector<1x1x8x128xf32>
    %74 = vector.shape_cast %73 : vector<1x1x8x128xf32> to vector<8x128xf32>
    %75 = vector.shape_cast %72 : vector<8x128xf32> to vector<1x1x8x128xf32>
    tpu.vector_store %arg4[%c0_26, %c0_27, %c0_28, %c0_29], %75 {strides = array<i32>} : memref<1x4x8x128xf32, #tpu.memory_space<vmem>>, vector<1x1x8x128xf32>,
    %c0_30 = arith.constant 0 : index
    %c1 = arith.constant 1 : index
    %c0_31 = arith.constant 0 : index
    %c0_32 = arith.constant 0 : index
    %76 = vector.load %arg4[%c0_30, %c1, %c0_31, %c0_32] : memref<1x4x8x128xf32, #tpu.memory_space<vmem>>, vector<1x1x8x128xf32>
    %77 = vector.shape_cast %76 : vector<1x1x8x128xf32> to vector<8x128xf32>
    %78 = arith.addf %77, %63 : vector<8x128xf32>
    %c0_33 = arith.constant 0 : index
    %c1_34 = arith.constant 1 : index
    %c0_35 = arith.constant 0 : index
    %c0_36 = arith.constant 0 : index
    %79 = vector.load %arg4[%c0_33, %c1_34, %c0_35, %c0_36] : memref<1x4x8x128xf32, #tpu.memory_space<vmem>>, vector<1x1x8x128xf32>
    %80 = vector.shape_cast %79 : vector<1x1x8x128xf32> to vector<8x128xf32>
    %81 = vector.shape_cast %78 : vector<8x128xf32> to vector<1x1x8x128xf32>
    tpu.vector_store %arg4[%c0_33, %c1_34, %c0_35, %c0_36], %81 {strides = array<i32>} : memref<1x4x8x128xf32, #tpu.memory_space<vmem>>, vector<1x1x8x128xf32>,
    %c0_37 = arith.constant 0 : index
    %c2 = arith.constant 2 : index
    %c0_38 = arith.constant 0 : index
    %c0_39 = arith.constant 0 : index
    %82 = vector.load %arg4[%c0_37, %c2, %c0_38, %c0_39] : memref<1x4x8x128xf32, #tpu.memory_space<vmem>>, vector<1x1x8x128xf32>
    %83 = vector.shape_cast %82 : vector<1x1x8x128xf32> to vector<8x128xf32>
    %84 = arith.addf %83, %66 : vector<8x128xf32>
    %c0_40 = arith.constant 0 : index
    %c2_41 = arith.constant 2 : index
    %c0_42 = arith.constant 0 : index
    %c0_43 = arith.constant 0 : index
    %85 = vector.load %arg4[%c0_40, %c2_41, %c0_42, %c0_43] : memref<1x4x8x128xf32, #tpu.memory_space<vmem>>, vector<1x1x8x128xf32>
    %86 = vector.shape_cast %85 : vector<1x1x8x128xf32> to vector<8x128xf32>
    %87 = vector.shape_cast %84 : vector<8x128xf32> to vector<1x1x8x128xf32>
    tpu.vector_store %arg4[%c0_40, %c2_41, %c0_42, %c0_43], %87 {strides = array<i32>} : memref<1x4x8x128xf32, #tpu.memory_space<vmem>>, vector<1x1x8x128xf32>,
    %c0_44 = arith.constant 0 : index
    %c3 = arith.constant 3 : index
    %c0_45 = arith.constant 0 : index
    %c0_46 = arith.constant 0 : index
    %88 = vector.load %arg4[%c0_44, %c3, %c0_45, %c0_46] : memref<1x4x8x128xf32, #tpu.memory_space<vmem>>, vector<1x1x8x128xf32>
    %89 = vector.shape_cast %88 : vector<1x1x8x128xf32> to vector<8x128xf32>
    %90 = arith.addf %89, %69 : vector<8x128xf32>
    %c0_47 = arith.constant 0 : index
    %c3_48 = arith.constant 3 : index
    %c0_49 = arith.constant 0 : index
    %c0_50 = arith.constant 0 : index
    %91 = vector.load %arg4[%c0_47, %c3_48, %c0_49, %c0_50] : memref<1x4x8x128xf32, #tpu.memory_space<vmem>>, vector<1x1x8x128xf32>
    %92 = vector.shape_cast %91 : vector<1x1x8x128xf32> to vector<8x128xf32>
    %93 = vector.shape_cast %90 : vector<8x128xf32> to vector<1x1x8x128xf32>
    tpu.vector_store %arg4[%c0_47, %c3_48, %c0_49, %c0_50], %93 {strides = array<i32>} : memref<1x4x8x128xf32, #tpu.memory_space<vmem>>, vector<1x1x8x128xf32>,
    return
  }
  func.func @transform_0(%arg0: i32, %arg1: i32) -> (i32, i32) {
    %c1_i32 = arith.constant 1 : i32
    %0 = arith.muli %arg0, %c1_i32 : i32
    %1 = arith.addi %0, %arg1 : i32
    %c0_i32 = arith.constant 0 : i32
    %2 = arith.minsi %1, %c0_i32 : i32
    %c0_i32_0 = arith.constant 0 : i32
    %c0_i32_1 = arith.constant 0 : i32
    return %2, %c0_i32_0 : i32, i32
  }
  func.func @transform_1(%arg0: i32, %arg1: i32) -> (i32, i32) {
    %c1_i32 = arith.constant 1 : i32
    %0 = arith.muli %arg0, %c1_i32 : i32
    %1 = arith.addi %0, %arg1 : i32
    %c0_i32 = arith.constant 0 : i32
    %2 = arith.minsi %1, %c0_i32 : i32
    %c0_i32_0 = arith.constant 0 : i32
    %c0_i32_1 = arith.constant 0 : i32
    return %2, %c0_i32_0 : i32, i32
  }
  func.func @transform_2(%arg0: i32, %arg1: i32) -> (i32, i32, i32, i32) {
    %c0_i32 = arith.constant 0 : i32
    %c0_i32_0 = arith.constant 0 : i32
    %c0_i32_1 = arith.constant 0 : i32
    %c0_i32_2 = arith.constant 0 : i32
    return %arg0, %c0_i32, %c0_i32_0, %c0_i32_1 : i32, i32, i32, i32
  }
}

</mosaic_0001>

<bundles_post_ra>
// kernel: tpu_custom_call.1
= control target key start
LH: loop header
LB: loop body
LE: loop exit
PB: predicated region body
PF: predicated region fallthrough
CT: control target
= control target key end

     0   :  { %7 = vsyncpa [#allocation3], 0  ;;  %s359_s0 = inlined_call_operand.hbm [shape: f32[16,128], index: 0, kind: input, shape index: {}]   ;;  %s360_s1 = inlined_call_operand.hbm [shape: f32[16,128], index: 1, kind: input, shape index: {}]   ;;  %s361_s2 = inlined_call_operand.hbm [shape: f32[1,4,8,128], index: 2, kind: output, shape index: {}]  }
   0x1   :  { %8 = vsyncpa [#allocation6], 0 }
   0x2   :  { %9 = vsyncpa [#allocation4], 0  ;;  %s291_s9 = smov [#allocation2]  }
   0x3   :  { %s21_s10 = sshll.u32 %s291_s9, 4  ;;  %s22_s10 = int_to_ptr.vmem [resolvable:$true] %s21_s10 }
   0x4   :  { %s233_s11 = scalar_lea.vmem %s22_s10, 256  ;;  %p238_p1 = scmp.lt.s32.totalorder %s22_s10, %s22_s10 }
   0x5   :  { %p234_p0 = scmp.ne.s32.totalorder %s22_s10, %s233_s11  ;;  %p239_p2 = scmp.lt.s32.totalorder %s233_s11, %s233_s11 }
   0x7   :  { %p240_p3 = por %p239_p2, %p238_p1 }
   0x9   :  { %p241_p4 = pnand %p240_p3, %p234_p0 }
   0xb   :  { %244 = shalt.err (!%p241_p4)
}
   0xc   :  { %s292_s12 = smov 128   ;;  %s293_s13 = smov 8  }
   0xd   :  { %27 = dma.hbm_to_vmem [thread:$0]  %s359_s0, 256, %s22_s10, [#allocation3], %s292_s12, %s292_s12, %s293_s13  }
   0xe   :  { %s294_s16 = smov [#allocation5]  }
   0xf   :  { %s39_s17 = sshll.u32 %s294_s16, 4  ;;  %s40_s17 = int_to_ptr.vmem [resolvable:$true] %s39_s17 }
  0x10   :  { %s253_s18 = scalar_lea.vmem %s40_s17, 256  ;;  %p258_p6 = scmp.lt.s32.totalorder %s40_s17, %s40_s17 }
  0x11   :  { %p254_p5 = scmp.ne.s32.totalorder %s40_s17, %s253_s18  ;;  %p259_p7 = scmp.lt.s32.totalorder %s253_s18, %s253_s18 }
  0x13   :  { %p260_p8 = por %p259_p7, %p258_p6 }
  0x15   :  { %p261_p9 = pnand %p260_p8, %p254_p5 }
  0x17   :  { %264 = shalt.err (!%p261_p9)
}
  0x18   :  { %45 = dma.hbm_to_vmem [thread:$0]  %s360_s1, 256, %s40_s17, [#allocation6], %s292_s12, %s292_s12, %s293_s13  }
  0x19   :  { %285 = dma.done.wait [#allocation3], 256  }
  0x1a   :  { %286 = vsyncadd [#allocation3], 4294967040 }
  0x1b   :  { %287 = dma.done.wait [#allocation6], 256  }
  0x1c   :  { %288 = vsyncadd [#allocation6], 4294967040  ;;  %v323_v0 = vld [vmem:[#allocation2] sm:$0xff]  ;;  %v325_v1 = vld [vmem:[#allocation2 + $0x8] sm:$0xff]  ;;  %s295_s0 = smov [#allocation7]  }
  0x1d   :  { %v327_v2 = vld [vmem:[#allocation5] sm:$0xff]  ;;  %v329_v3 = vld [vmem:[#allocation5 + $0x8] sm:$0xff]  ;;  %v120_v5 = vand.u32 2147483647, %v323_v0  ;;  %v121_v6 = vand.u32 2147483647, %v325_v1 }
  0x1e   :  { %v72_v4 = vmul.f32 2.0, %v327_v2  ;;  %v73_v7 = vmul.f32 2.0, %v329_v3  ;;  %v158_v8 = vadd.f32 %v329_v3, %v327_v2  ;;  %vm144_vm0 = vcmp.ge.f32.partialorder %v323_v0, 0.0  ;;  %s180_s1 = sshll.u32 %s295_s0, 4  ;;  %s181_s1 = int_to_ptr.vmem [resolvable:$true] %s180_s1 }
  0x1f   :  { %v122_v10 = vsub.f32 0.0, %v120_v5  ;;  %v123_v11 = vsub.f32 0.0, %v121_v6  ;;  %vm145_vm1 = vcmp.ge.f32.partialorder %v325_v1, 0.0  ;;  %s265_s21 = scalar_lea.vmem %s181_s1, 512  ;;  %p270_p11 = scmp.lt.s32.totalorder %s181_s1, %s181_s1 }
  0x20   :  { %v197_v9 = vadd.f32 -1.0, %v72_v4  ;;  %v198_v12 = vadd.f32 -1.0, %v73_v7  ;;  %174 = vst [vmem:[#allocation7 + $0x18] sm:$0xff] %v158_v8  ;;  %p266_p10 = scmp.ne.s32.totalorder %s181_s1, %s265_s21  ;;  %p271_p12 = scmp.lt.s32.totalorder %s265_s21, %s265_s21 }
  0x21   :  { %v124_v14 = vmul.f32 1.442695, %v122_v10  ;;  %v126_v15 = vmul.f32 1.442695, %v123_v11 }
  0x22   :  { %v338_v13 = vmul.f32 %v197_v9, %v323_v0  ;;  %v341_v16 = vmul.f32 %v198_v12, %v325_v1  ;;  %p272_p13 = por %p271_p12, %p270_p11 }
  0x23   :  { %205 = vpow2.f32 %v124_v14 }
  0x24   :  { %v78_v17 = vand.u32 2147483647, %v338_v13  ;;  %v79_v18 = vand.u32 2147483647, %v341_v16  ;;  %207 = vpow2.f32 %v126_v15  ;;  %v92_v0 = vmin.f32 %v338_v13, 0.0  ;;  %p273_p0 = pnand %p272_p13, %p266_p10 }
  0x25   :  { %v93_v1 = vmin.f32 %v341_v16, 0.0  ;;  %vm110_vm2 = vcmp.ge.f32.partialorder %v338_v13, 0.0  ;;  %vm111_vm3 = vcmp.ge.f32.partialorder %v341_v16, 0.0 }
  0x26   :  { %v80_v19 = vsub.f32 0.0, %v78_v17  ;;  %v81_v20 = vsub.f32 0.0, %v79_v18 }
  0x28   :  { %v82_v21 = vmul.f32 1.442695, %v80_v19  ;;  %v84_v22 = vmul.f32 1.442695, %v81_v20 }
  0x2a   :  { %209 = vpow2.f32 %v82_v21 }
  0x2b   :  { %211 = vpow2.f32 %v84_v22 }
  0x30   :  { %v206_v23 = vpop.eup %205 }
  0x31   :  { %v208_v24 = vpop.eup %207  ;;  %v128_v25 = vadd.f32 1.0, %v206_v23 }
  0x32   :  { %v129_v26 = vadd.f32 1.0, %v208_v24 }
  0x33   :  { %213 = vrcp.f32 %v128_v25 }
  0x34   :  { %215 = vrcp.f32 %v129_v26 }
  0x37   :  { %v210_v27 = vpop.eup %209 }
  0x38   :  { %v212_v28 = vpop.eup %211  ;;  %v86_v29 = vadd.f32 1.0, %v210_v27 }
  0x39   :  { %v87_v30 = vadd.f32 1.0, %v212_v28 }
  0x3a   :  { %217 = vrcp.f32 %v86_v29 }
  0x3b   :  { %219 = vrcp.f32 %v87_v30 }
  0x3c   :  { %221 = vlog2.f32 %v86_v29 }
  0x3d   :  { %223 = vlog2.f32 %v87_v30 }
  0x40   :  { %v214_v31 = vpop.eup %213 }
  0x41   :  { %v216_v32 = vpop.eup %215  ;;  %v132_v33 = vmul.f32 %v214_v31, %v128_v25 }
  0x42   :  { %v133_v34 = vmul.f32 %v216_v32, %v129_v26 }
  0x43   :  { %v134_v35 = vsub.f32 2.0, %v132_v33 }
  0x44   :  { %v135_v36 = vsub.f32 2.0, %v133_v34 }
  0x45   :  { %v136_v37 = vmul.f32 %v214_v31, %v134_v35 }
  0x46   :  { %v137_v38 = vmul.f32 %v216_v32, %v135_v36 }
  0x47   :  { %v138_v39 = vmul.f32 %v136_v37, %v128_v25  ;;  %v218_v40 = vpop.eup %217 }
  0x48   :  { %v139_v41 = vmul.f32 %v137_v38, %v129_v26  ;;  %v220_v42 = vpop.eup %219  ;;  %v98_v43 = vmul.f32 %v218_v40, %v86_v29 }
  0x49   :  { %v140_v44 = vsub.f32 2.0, %v138_v39  ;;  %v99_v45 = vmul.f32 %v220_v42, %v87_v30  ;;  %v222_v55 = vpop.eup %221 }
  0x4a   :  { %v141_v46 = vsub.f32 2.0, %v139_v41  ;;  %v100_v47 = vsub.f32 2.0, %v98_v43  ;;  %v224_v58 = vpop.eup %223  ;;  %v89_v5 = vmul.f32 0.6931472, %v222_v55 }
  0x4b   :  { %v142_v48 = vmul.f32 %v140_v44, %v136_v37  ;;  %v101_v49 = vsub.f32 2.0, %v99_v45  ;;  %v91_v7 = vmul.f32 0.6931472, %v224_v58 }
  0x4c   :  { %v143_v50 = vmul.f32 %v141_v46, %v137_v38  ;;  %v102_v51 = vmul.f32 %v218_v40, %v100_v47 }
  0x4d   :  { %v146_v52 = vmul.f32 %v206_v23, %v142_v48  ;;  %v103_v53 = vmul.f32 %v220_v42, %v101_v49 }
  0x4e   :  { %v147_v54 = vmul.f32 %v208_v24, %v143_v50  ;;  %v104_v56 = vmul.f32 %v102_v51, %v86_v29 }
  0x4f   :  { %v148_v57 = vsel %vm144_vm0, %v142_v48, %v146_v52  ;;  %v105_v59 = vmul.f32 %v103_v53, %v87_v30 }
  0x50   :  { %v149_v60 = vsel %vm145_vm1, %v143_v50, %v147_v54  ;;  %v150_v61 = vmul.f32 %v148_v57, %v327_v2  ;;  %v106_v62 = vsub.f32 2.0, %v104_v56  ;;  %v94_v2 = vsub.f32 %v89_v5, %v92_v0 }
  0x51   :  { %v151_v63 = vmul.f32 %v149_v60, %v329_v3  ;;  %v156_v4 = vadd.f32 %v149_v60, %v148_v57  ;;  %v107_v6 = vsub.f32 2.0, %v105_v59  ;;  %v95_v3 = vsub.f32 %v91_v7, %v93_v1 }
  0x52   :  { %v108_v8 = vmul.f32 %v106_v62, %v102_v51 }
  0x53   :  { %v154_v9 = vadd.f32 %v151_v63, %v150_v61  ;;  %v109_v10 = vmul.f32 %v107_v6, %v103_v53  ;;  %170 = vst [vmem:[#allocation7 + $0x10] sm:$0xff] %v156_v4 }
  0x54   :  { %v112_v11 = vmul.f32 %v210_v27, %v108_v8 }
  0x55   :  { %v113_v12 = vmul.f32 %v212_v28, %v109_v10  ;;  %166 = vst [vmem:[#allocation7 + $0x8] sm:$0xff] %v154_v9 }
  0x56   :  { %v114_v14 = vsel %vm110_vm2, %v112_v11, %v108_v8 }
  0x57   :  { %v115_v15 = vsel %vm111_vm3, %v113_v12, %v109_v10  ;;  %v116_v17 = vmul.f32 %v114_v14, %v114_v14 }
  0x58   :  { %v117_v18 = vmul.f32 %v115_v15, %v115_v15 }
  0x59   :  { %v118_v19 = vmul.f32 %v116_v17, %v94_v2 }
  0x5a   :  { %v119_v20 = vmul.f32 %v117_v18, %v95_v3 }
  0x5c   :  { %v152_v21 = vadd.f32 %v119_v20, %v118_v19 }
  0x5e   :  { %162 = vst [vmem:[#allocation7] sm:$0xff] %v152_v21 }
  0x5f   :  { %276 = shalt.err (!%p273_p0)
}
  0x60   :  { %186 = dma.vmem_to_hbm [thread:$0]  %s181_s1, 512, %s361_s2, [#allocation4], %s292_s12, %s292_s12, %s293_s13  }
  0x61   :  { %289 = dma.done.wait [#allocation4], 512  }
  0x62   :  { %290 = vsyncadd [#allocation4], 4294966784 }
  0x63   :  { %190 = vsyncpa [#allocation3], 1 }
  0x64   :  { %191 = vsyncpa [#allocation6], 1 }
  0x65   :  { %192 = vsyncpa [#allocation4], 1 }

</bundles_post_ra>
